<compile_context>
chip_gen: v7x
topology: tpu7x:2x2x1
jax: 0.10.0
libtpu: 0.0.40
codegen_flags: <defaults>
</compile_context>

<pallas_src>
import functools

import numpy as np
import jax
import jax.numpy as jnp
from jax import lax
from jax.experimental import pallas as pl
from jax.experimental.pallas import tpu as pltpu


_SENTINEL = np.int32(2**31 - 1)  # voxel key assigned to filtered-out points


def _pass0_kernel(pc_ref, b_ref, coords_ref, key_ref, *,
                  xmin, xmax, ymin, ymax, xscale, yscale, sx, sy):
    """filter_pc mask + sparse_quantize + lexicographic int32 voxel key."""
    eps = 1e-4
    x = pc_ref[0, :]
    y = pc_ref[1, :]
    b = b_ref[0, :]
    valid = ((x > xmin + eps) & (x < xmax - eps)
             & (y > ymin + eps) & (y < ymax - eps))
    # Valid points are strictly inside the range, so values are >= 0 and the
    # truncating int32 cast equals floor(); invalid points are clamped to 0.
    # xscale/yscale are host-precomputed sx/(xmax-xmin), sy/(ymax-ymin): a
    # multiply instead of a per-element divide.
    xi = jnp.where(valid, (x - xmin) * xscale, 0.0).astype(jnp.int32)
    yi = jnp.where(valid, (y - ymin) * yscale, 0.0).astype(jnp.int32)
    bb = jnp.where(valid, b, 0)
    # Single int32 key whose numeric order equals the lexicographic order that
    # torch.unique(dim=0) uses.  Requires (max_batch+1)*sx*sy < 2**31.
    key = bb * jnp.int32(sx * sy) + xi * jnp.int32(sy) + yi
    key = jnp.where(valid, key, _SENTINEL)
    coords_ref[0, :] = bb
    coords_ref[1, :] = xi
    coords_ref[2, :] = yi
    key_ref[0, :] = key


def _pass1_kernel(key_all_ref, first_ref, *, tile, jblk):
    """Per-tile first-occurrence flags (bf16), chunked over the j dimension."""
    t = pl.program_id(0)
    tstart = pl.multiple_of(t * tile, tile)
    key_t = key_all_ref[0, pl.ds(tstart, tile)]          # (tile,) lane-dense
    valid_t = key_t != _SENTINEL

    ones8 = jnp.ones((8, jblk), jnp.bfloat16)            # hoisted out of loop

    # Chunks that lie entirely before this tile: j < i holds trivially, so the
    # triangular mask disappears for them.
    n_full = (t * tile) // jblk

    def body(c, acc):
        cs = pl.multiple_of(c * jblk, jblk)
        key_blk = key_all_ref[0, pl.ds(cs, jblk)]        # (jblk,)
        eq = (key_blk[:, None] == key_t[None, :]).astype(jnp.bfloat16)
        # Column sum on the MXU: (8, jblk) @ (jblk, tile) -> (8, tile) f32.
        return acc + jnp.dot(ones8, eq, preferred_element_type=jnp.float32)

    acc = lax.fori_loop(0, n_full, body, jnp.zeros((8, tile), jnp.float32))

    # Diagonal chunk (the one containing this tile): needs the j < i mask,
    # built from a (jblk,1) row index against a (1,tile) lane iota (no
    # (Np, tile) iota temps).
    dstart = pl.multiple_of(n_full * jblk, jblk)
    key_blk = key_all_ref[0, pl.ds(dstart, jblk)]
    row_j = n_full * jblk + lax.broadcasted_iota(jnp.int32, (jblk, 1), 0)
    col_i = t * tile + lax.broadcasted_iota(jnp.int32, (1, tile), 1)
    dup = (key_blk[:, None] == key_t[None, :]) & (row_j < col_i)
    acc = acc + jnp.dot(ones8, dup.astype(jnp.bfloat16),
                        preferred_element_type=jnp.float32)

    dup_before = acc[0, :]
    first_occ = (dup_before < 0.5) & valid_t
    first_ref[0, :] = first_occ.astype(jnp.bfloat16)


def _pass2_kernel(key_all_ref, first_all_ref, rank_ref, *, tile, jblk, n_chunks):
    """Per-tile sorted-unique voxel index (== unq_inv), chunked over j."""
    t = pl.program_id(0)
    tstart = pl.multiple_of(t * tile, tile)
    key_t = key_all_ref[0, pl.ds(tstart, tile)]
    valid_t = key_t != _SENTINEL

    def body(c, acc):
        cs = pl.multiple_of(c * jblk, jblk)
        key_blk = key_all_ref[0, pl.ds(cs, jblk)]        # (jblk,) int32
        fo_blk = first_all_ref[0, pl.ds(cs, jblk)]       # (jblk,) bf16 0/1
        # less[j, i] = 1 iff key_all[j] < key_t[i]; rank = sum_j fo[j]*less[j,i]
        less = (key_blk[:, None] < key_t[None, :]).astype(jnp.bfloat16)
        fo8 = jnp.broadcast_to(fo_blk[None, :], (8, jblk))
        return acc + jnp.dot(fo8, less, preferred_element_type=jnp.float32)

    acc = lax.fori_loop(0, n_chunks, body, jnp.zeros((8, tile), jnp.float32))
    rank = jnp.where(valid_t, acc[0, :].astype(jnp.int32), jnp.int32(-1))
    rank_ref[0, :] = rank


def bev_formalization(pc, batch_idx, point_cloud_range, spatial_shape, *,
                      num_batches=8, tile_n=256, jblk=2048):
    """Returns (unq, unq_inv, n_unique, n_valid).

    unq      : (N, 3) int32 — first n_unique rows are the sorted unique
               (batch, x-bin, y-bin) voxels, rest padded with -1.
    unq_inv  : (N,)   int32 — first n_valid entries are the inverse indices of
               the filtered points (in original order), rest padded with -1.

    tile_n: 256 recommended on v6e/v7x (256-wide MXU), 128 on v5e.
    jblk  : j-chunk size; bounds per-step VMEM at ~jblk*tile bytes-scale.
    """
    N = pc.shape[0]
    xmin, ymin = float(point_cloud_range[0]), float(point_cloud_range[1])
    xmax, ymax = float(point_cloud_range[3]), float(point_cloud_range[4])
    sx, sy = int(spatial_shape[0]), int(spatial_shape[1])
    assert num_batches * sx * sy < 2**31, \
        "int32 voxel-key overflow: need (max_batch+1)*sx*sy < 2**31"
    assert N < 2**24, "f32 MXU accumulation is exact only for N < 2**24"
    assert tile_n % 128 == 0 and tile_n > 0, "tile_n must be a multiple of 128"

    # j-chunk size: a multiple of the tile so every tile lies inside exactly
    # one chunk (the "diagonal" chunk); pad Np so chunks tile the point axis.
    jblk = max(tile_n, (int(jblk) // tile_n) * tile_n)
    np_t = ((N + tile_n - 1) // tile_n) * tile_n
    if np_t <= jblk:
        jblk = np_t
        Np = np_t
    else:
        Np = ((np_t + jblk - 1) // jblk) * jblk
    pad = Np - N
    num_tiles = Np // tile_n
    n_chunks = Np // jblk

    # Channel-major (lane-dense) device layout; padded points sit far outside
    # the range so they are filtered out.
    pc_cm = jnp.transpose(pc.astype(jnp.float32))                  # (2, N)
    b_cm = jnp.reshape(batch_idx, (-1,)).astype(jnp.int32)[None]   # (1, N)
    if pad:
        pc_cm = jnp.concatenate(
            [pc_cm, jnp.full((2, pad), xmin - 1e6, jnp.float32)], axis=1)
        b_cm = jnp.concatenate([b_cm, jnp.zeros((1, pad), jnp.int32)], axis=1)

    # VMEM ceiling derived from the per-chunk working set (not Np) plus the
    # resident key / first-flag buffers; capped to stay v7x-safe (64 MiB/TC).
    vmem_limit = int(min(40 * 1024 * 1024,
                         16 * 1024 * 1024 + 10 * jblk * tile_n + 16 * Np))
    cparams = pltpu.CompilerParams(dimension_semantics=("parallel",),
                                   vmem_limit_bytes=vmem_limit)

    tile_pc_spec = pl.BlockSpec((2, tile_n), lambda t: (0, t))
    tile_b_spec = pl.BlockSpec((1, tile_n), lambda t: (0, t))
    full_row_spec = pl.BlockSpec((1, Np), lambda t: (0, 0))

    xscale = sx / (xmax - xmin)
    yscale = sy / (ymax - ymin)

    # ---- pass 0: per-point voxel coords + int32 key (computed once) --------
    coords_cm, key_cm = pl.pallas_call(
        functools.partial(_pass0_kernel, xmin=xmin, xmax=xmax, ymin=ymin,
                          ymax=ymax, xscale=xscale, yscale=yscale,
                          sx=sx, sy=sy),
        grid=(num_tiles,),
        in_specs=[tile_pc_spec, tile_b_spec],
        out_specs=(pl.BlockSpec((3, tile_n), lambda t: (0, t)),
                   pl.BlockSpec((1, tile_n), lambda t: (0, t))),
        out_shape=(jax.ShapeDtypeStruct((3, Np), jnp.int32),
                   jax.ShapeDtypeStruct((1, Np), jnp.int32)),
        compiler_params=cparams,
    )(pc_cm, b_cm)

    # ---- pass 1: first-occurrence flags (bf16) ------------------------------
    first_cm = pl.pallas_call(
        functools.partial(_pass1_kernel, tile=tile_n, jblk=jblk),
        grid=(num_tiles,),
        in_specs=[full_row_spec],
        out_specs=pl.BlockSpec((1, tile_n), lambda t: (0, t)),
        out_shape=jax.ShapeDtypeStruct((1, Np), jnp.bfloat16),
        compiler_params=cparams,
    )(key_cm)

    # ---- pass 2: global ranks (inverse indices) ------------------------------
    rank_cm = pl.pallas_call(
        functools.partial(_pass2_kernel, tile=tile_n, jblk=jblk,
                          n_chunks=n_chunks),
        grid=(num_tiles,),
        in_specs=[full_row_spec, full_row_spec],
        out_specs=pl.BlockSpec((1, tile_n), lambda t: (0, t)),
        out_shape=jax.ShapeDtypeStruct((1, Np), jnp.int32),
        compiler_params=cparams,
    )(key_cm, first_cm)

    # ---- wrapper post-processing (static-shape unique) -----------------------
    coords = jnp.transpose(coords_cm)[:N]          # (N, 3) point-major again
    first1 = first_cm[0, :N] > 0
    rank1 = rank_cm[0, :N]
    valid = rank1 >= 0
    n_valid = jnp.sum(valid.astype(jnp.int32))
    n_unique = jnp.sum(first1.astype(jnp.int32))

    # unq: scatter each first-occurrence voxel to its sorted-unique position.
    scatter_idx = jnp.where(first1, rank1, N)              # N -> dropped
    unq = jnp.full((N, 3), -1, jnp.int32).at[scatter_idx].set(coords,
                                                              mode="drop")

    # unq_inv: compact ranks of kept points to the front (original order) with
    # a cumsum scatter (stable partition, no sort), pad with -1.
    pos = jnp.cumsum(valid.astype(jnp.int32)) - 1
    inv_idx = jnp.where(valid, pos, N)                      # N -> dropped
    unq_inv = jnp.full((N,), -1, jnp.int32).at[inv_idx].set(rank1, mode="drop")

    return unq, unq_inv, n_unique, n_valid


if __name__ == "__main__":
    point_cloud_range = [-10.0, -10.0, -2.0, 10.0, 10.0, 2.0]
    spatial_shape = (16, 16)
    N = 200   # padded to 256 internally -> 2 grid tiles of 128, 2 j-chunks of 128

    key0 = jax.random.PRNGKey(0)
    kpc, kb = jax.random.split(key0)
    # Sample slightly beyond the range so some points get filtered out.
    pc = jax.random.uniform(kpc, (N, 2), jnp.float32, minval=-12.0, maxval=12.0)
    batch_idx = jax.random.randint(kb, (N, 1), 0, 2, dtype=jnp.int32)

    unq, unq_inv, n_unique, n_valid = bev_formalization(
        pc, batch_idx, point_cloud_range, spatial_shape,
        num_batches=2, tile_n=128, jblk=128)
    jax.block_until_ready((unq, unq_inv, n_unique, n_valid))

    # ---- numpy reference reproducing the torch semantics ----
    pc_np = np.asarray(pc, dtype=np.float32)
    b_np = np.asarray(batch_idx[:, 0]).astype(np.int64)
    xmin, ymin = point_cloud_range[0], point_cloud_range[1]
    xmax, ymax = point_cloud_range[3], point_cloud_range[4]
    sx, sy = spatial_shape
    mask = ((pc_np[:, 0] > np.float32(xmin + 1e-4))
            & (pc_np[:, 0] < np.float32(xmax - 1e-4))
            & (pc_np[:, 1] > np.float32(ymin + 1e-4))
            & (pc_np[:, 1] < np.float32(ymax - 1e-4)))
    fpc = pc_np[mask]
    fb = b_np[mask]
    assert fpc.shape[0] >= 10, "test setup should not hit the <10-points fallback"
    xscale = np.float32(sx / (xmax - xmin))
    yscale = np.float32(sy / (ymax - ymin))
    xi_ref = ((fpc[:, 0] - np.float32(xmin)) * xscale).astype(np.int64)
    yi_ref = ((fpc[:, 1] - np.float32(ymin)) * yscale).astype(np.int64)
    bxyz = np.stack([fb, xi_ref, yi_ref], axis=-1)
    unq_ref, inv_ref = np.unique(bxyz, axis=0, return_inverse=True)
    inv_ref = inv_ref.reshape(-1)

    nu = int(n_unique)
    nv = int(n_valid)
    assert nu == unq_ref.shape[0], (nu, unq_ref.shape[0])
    assert nv == inv_ref.shape[0], (nv, inv_ref.shape[0])
    np.testing.assert_array_equal(np.asarray(unq)[:nu], unq_ref.astype(np.int32))
    np.testing.assert_array_equal(np.asarray(unq_inv)[:nv],
                                  inv_ref.astype(np.int32))

    print("KERNEL_OK")
</pallas_src>

<mosaic_0001>
module attributes {stable_mosaic.version = 11 : i64} {
  func.func @_pass0_kernel(%arg0: i32, %arg1: memref<2x128xf32, #tpu.memory_space<vmem>>, %arg2: memref<1x128xi32, #tpu.memory_space<vmem>>, %arg3: memref<3x128xi32, #tpu.memory_space<vmem>>, %arg4: memref<1x128xi32, #tpu.memory_space<vmem>>) attributes {dimension_semantics = [#tpu.dimension_semantics<parallel>], iteration_bounds = array<i64: 2>, scalar_prefetch = 0 : i64, scratch_operands = 0 : i64, tpu.core_type = #tpu.core_type<tc>, window_params = [{transform_indices = @transform_0, window_bounds = array<i64: 2, 128>}, {transform_indices = @transform_1, window_bounds = array<i64: 1, 128>}, {transform_indices = @transform_2, window_bounds = array<i64: 3, 128>}, {transform_indices = @transform_3, window_bounds = array<i64: 1, 128>}]} {
    %c0 = arith.constant 0 : index
    %c0_0 = arith.constant 0 : index
    %0 = vector.load %arg1[%c0, %c0_0] : memref<2x128xf32, #tpu.memory_space<vmem>>, vector<1x128xf32>
    %1 = vector.shape_cast %0 : vector<1x128xf32> to vector<128xf32>
    %c1 = arith.constant 1 : index
    %c0_1 = arith.constant 0 : index
    %2 = vector.load %arg1[%c1, %c0_1] : memref<2x128xf32, #tpu.memory_space<vmem>>, vector<1x128xf32>
    %3 = vector.shape_cast %2 : vector<1x128xf32> to vector<128xf32>
    %c0_2 = arith.constant 0 : index
    %c0_3 = arith.constant 0 : index
    %4 = vector.load %arg2[%c0_2, %c0_3] : memref<1x128xi32, #tpu.memory_space<vmem>>, vector<1x128xi32>
    %5 = vector.shape_cast %4 : vector<1x128xi32> to vector<128xi32>
    %cst = arith.constant -9.99989986 : f32
    %6 = vector.broadcast %cst : f32 to vector<128xf32>
    %7 = arith.cmpf ogt, %1, %6 : vector<128xf32>
    %cst_4 = arith.constant 9.99989986 : f32
    %8 = vector.broadcast %cst_4 : f32 to vector<128xf32>
    %9 = arith.cmpf olt, %1, %8 : vector<128xf32>
    %10 = arith.andi %7, %9 : vector<128xi1>
    %cst_5 = arith.constant -9.99989986 : f32
    %11 = vector.broadcast %cst_5 : f32 to vector<128xf32>
    %12 = arith.cmpf ogt, %3, %11 : vector<128xf32>
    %13 = arith.andi %10, %12 : vector<128xi1>
    %cst_6 = arith.constant 9.99989986 : f32
    %14 = vector.broadcast %cst_6 : f32 to vector<128xf32>
    %15 = arith.cmpf olt, %3, %14 : vector<128xf32>
    %16 = arith.andi %13, %15 : vector<128xi1>
    %cst_7 = arith.constant -1.000000e+01 : f32
    %17 = vector.broadcast %cst_7 : f32 to vector<128xf32>
    %18 = arith.subf %1, %17 : vector<128xf32>
    %cst_8 = arith.constant 8.000000e-01 : f32
    %19 = vector.broadcast %cst_8 : f32 to vector<128xf32>
    %20 = arith.mulf %18, %19 : vector<128xf32>
    %cst_9 = arith.constant 0.000000e+00 : f32
    %21 = vector.broadcast %cst_9 : f32 to vector<128xf32>
    %22 = arith.select %16, %20, %21 : vector<128xi1>, vector<128xf32>
    %23 = arith.fptosi %22 : vector<128xf32> to vector<128xi32>
    %cst_10 = arith.constant -1.000000e+01 : f32
    %24 = vector.broadcast %cst_10 : f32 to vector<128xf32>
    %25 = arith.subf %3, %24 : vector<128xf32>
    %cst_11 = arith.constant 8.000000e-01 : f32
    %26 = vector.broadcast %cst_11 : f32 to vector<128xf32>
    %27 = arith.mulf %25, %26 : vector<128xf32>
    %cst_12 = arith.constant 0.000000e+00 : f32
    %28 = vector.broadcast %cst_12 : f32 to vector<128xf32>
    %29 = arith.select %16, %27, %28 : vector<128xi1>, vector<128xf32>
    %30 = arith.fptosi %29 : vector<128xf32> to vector<128xi32>
    %c0_i32 = arith.constant 0 : i32
    %31 = vector.broadcast %c0_i32 : i32 to vector<128xi32>
    %32 = arith.select %16, %5, %31 : vector<128xi1>, vector<128xi32>
    %c256_i32 = arith.constant 256 : i32
    %33 = vector.broadcast %c256_i32 : i32 to vector<128xi32>
    %34 = arith.muli %32, %33 : vector<128xi32>
    %c16_i32 = arith.constant 16 : i32
    %35 = vector.broadcast %c16_i32 : i32 to vector<128xi32>
    %36 = arith.muli %23, %35 : vector<128xi32>
    %37 = arith.addi %34, %36 : vector<128xi32>
    %38 = arith.addi %37, %30 : vector<128xi32>
    %c2147483647_i32 = arith.constant 2147483647 : i32
    %39 = vector.broadcast %c2147483647_i32 : i32 to vector<128xi32>
    %40 = arith.select %16, %38, %39 : vector<128xi1>, vector<128xi32>
    %c0_13 = arith.constant 0 : index
    %c0_14 = arith.constant 0 : index
    %41 = vector.load %arg3[%c0_13, %c0_14] : memref<3x128xi32, #tpu.memory_space<vmem>>, vector<1x128xi32>
    %42 = vector.shape_cast %41 : vector<1x128xi32> to vector<128xi32>
    %43 = vector.shape_cast %32 : vector<128xi32> to vector<1x128xi32>
    tpu.vector_store %arg3[%c0_13, %c0_14], %43 {strides = array<i32>} : memref<3x128xi32, #tpu.memory_space<vmem>>, vector<1x128xi32>,
    %c1_15 = arith.constant 1 : index
    %c0_16 = arith.constant 0 : index
    %44 = vector.load %arg3[%c1_15, %c0_16] : memref<3x128xi32, #tpu.memory_space<vmem>>, vector<1x128xi32>
    %45 = vector.shape_cast %44 : vector<1x128xi32> to vector<128xi32>
    %46 = vector.shape_cast %23 : vector<128xi32> to vector<1x128xi32>
    tpu.vector_store %arg3[%c1_15, %c0_16], %46 {strides = array<i32>} : memref<3x128xi32, #tpu.memory_space<vmem>>, vector<1x128xi32>,
    %c2 = arith.constant 2 : index
    %c0_17 = arith.constant 0 : index
    %47 = vector.load %arg3[%c2, %c0_17] : memref<3x128xi32, #tpu.memory_space<vmem>>, vector<1x128xi32>
    %48 = vector.shape_cast %47 : vector<1x128xi32> to vector<128xi32>
    %49 = vector.shape_cast %30 : vector<128xi32> to vector<1x128xi32>
    tpu.vector_store %arg3[%c2, %c0_17], %49 {strides = array<i32>} : memref<3x128xi32, #tpu.memory_space<vmem>>, vector<1x128xi32>,
    %c0_18 = arith.constant 0 : index
    %c0_19 = arith.constant 0 : index
    %50 = vector.load %arg4[%c0_18, %c0_19] : memref<1x128xi32, #tpu.memory_space<vmem>>, vector<1x128xi32>
    %51 = vector.shape_cast %50 : vector<1x128xi32> to vector<128xi32>
    %52 = vector.shape_cast %40 : vector<128xi32> to vector<1x128xi32>
    tpu.vector_store %arg4[%c0_18, %c0_19], %52 {strides = array<i32>} : memref<1x128xi32, #tpu.memory_space<vmem>>, vector<1x128xi32>,
    return
  }
  func.func @transform_0(%arg0: i32) -> (i32, i32) {
    %c0_i32 = arith.constant 0 : i32
    %c0_i32_0 = arith.constant 0 : i32
    return %c0_i32, %arg0 : i32, i32
  }
  func.func @transform_1(%arg0: i32) -> (i32, i32) {
    %c0_i32 = arith.constant 0 : i32
    %c0_i32_0 = arith.constant 0 : i32
    return %c0_i32, %arg0 : i32, i32
  }
  func.func @transform_2(%arg0: i32) -> (i32, i32) {
    %c0_i32 = arith.constant 0 : i32
    %c0_i32_0 = arith.constant 0 : i32
    return %c0_i32, %arg0 : i32, i32
  }
  func.func @transform_3(%arg0: i32) -> (i32, i32) {
    %c0_i32 = arith.constant 0 : i32
    %c0_i32_0 = arith.constant 0 : i32
    return %c0_i32, %arg0 : i32, i32
  }
}

</mosaic_0001>

<bundles_post_ra>
// kernel: tpu_custom_call.1
= control target key start
LH: loop header
LB: loop body
LE: loop exit
PB: predicated region body
PF: predicated region fallthrough
CT: control target
= control target key end

     0   :  { %9 = vsyncpa [#allocation3], 0  ;;  %s816_s0 = inlined_call_operand.hbm [shape: f32[2,256], index: 0, kind: input, shape index: {}]   ;;  %s817_s1 = inlined_call_operand.vmem [shape: s32[1,256], index: 1, kind: input, shape index: {}]   ;;  %s818_s2 = inlined_call_operand.hbm [shape: s32[3,256], index: 2, kind: output, shape index: {0}]   ;;  %s819_s3 = inlined_call_operand.hbm [shape: s32[1,256], index: 3, kind: output, shape index: {1}]  }
   0x1   :  { %11 = vsyncpa [#allocation3 + $0x1], 0 }
   0x2   :  { %12 = vsyncpa [#allocation4], 0 }
   0x3   :  { %14 = vsyncpa [#allocation4 + $0x1], 0 }
   0x4   :  { %15 = vsyncpa [#allocation7], 0 }
   0x5   :  { %17 = vsyncpa [#allocation7 + $0x1], 0  ;;  %s599_s12 = smov 0   ;;  %s601_s13 = smov 0  }
   0x6   :  { %s603_s14 = smov 0   ;;  %s605_s15 = smov 0  }
   0x7 LB: > { %s620_s16 = sadd.s32 4294967295, %s574_s15   ;;  %s376_s17 = sadd.s32 4294967294, %s574_s15   ;;  %s574_s15 = sphi %s605_s15, %s836_s15   ;;  %s570_s14 = sphi %s603_s14, %s835_s14   ;;  %s566_s13 = sphi %s601_s13, %s834_s13   ;;  %s562_s12 = sphi %s599_s12, %s833_s12  }
   0x8   : > { %s624_s18 = sadd.s32 1, %s574_s15   ;;  %s30_s19 = sadd.s32 1, %s570_s14 }
   0x9   : > { %s27_s20 = ssub.s32 %s574_s15, %s624_s18  ;;  %p37_p0 = scmp.ne.s32.totalorder %s570_s14, %s566_s13 }
   0xa   : > { %p28_p1 = scmp.eq.s32.totalorder %s27_s20, 0  ;;  %p38_p2 = scmp.eq.s32.totalorder %s574_s15, 0 }
   0xb   : > { %p43_p3 = scmp.ne.s32.totalorder %s566_s13, %s562_s12  ;;  %p44_p4 = scmp.eq.s32.totalorder %s620_s16, 0 }
   0xc   : > { %s636_s21 = scalar_select %p28_p1, %s570_s14, %s30_s19  }
   0xd   : > { %p638_p5 = por %p38_p2, %p37_p0  ;;  %p642_p6 = por %p44_p4, %p43_p3 }
   0xe   : > { %p93_p7 = scmp.eq.s32.totalorder %s620_s16, 1  ;;  %p99_p8 = scmp.eq.s32.totalorder %s376_s17, 1 }
   0xf   : > { %p412_p10 = scmp.lt.s32.totalorder %s574_s15, 2  ;;  %s145_s26 = sand.u32 1, %s570_s14  }
  0x10   : > { %p649_p11 = por %p93_p7, %p37_p0  ;;  %p653_p12 = por %p99_p8, %p43_p3 }
  0x11   : > { %s380_s27 = sshll.u32 %s574_s15, 5  ;;  %s379_s28 = sshll.u32 %s145_s26, 1 }
  0x12   : > { %s823_s24 = scalar_select %p649_p11, 1, 0 }
  0x13   : > { %s824_s25 = scalar_select %p653_p12, 1, 0 }
  0x14   : > { %s662_s4 = scalar_lea.hbm %s816_s0, %s380_s27  ;;  %s149_s5 = scalar_lea.vmem [#allocation2], %s379_s28 }
  0x15   : > { %s156_s6 = sshll.u32 %s149_s5, 4  ;;  %p666_p13 = pnand %p412_p10, %p638_p5  ;;  %s670_s6 = int_to_ptr.vmem [resolvable:$true] %s156_s6 }
  0x16   : > { %s146_s8 = scalar_lea.sflag [#allocation3], %s145_s26  ;;  %s446_s9 = scalar_lea.hbm %s662_s4, 32 }
  0x17   : > { %p447_p2 = scmp.ne.s32.totalorder %s662_s4, %s446_s9  ;;  %p448_p3 = pneg %p666_p13 }
  0x18   : > { %s451_s17 = scalar_lea.hbm %s816_s0, 64  ;;  %p452_p5 = scmp.lt.u32.totalorder %s662_s4, %s816_s0 }
  0x19   : > { %p449_p4 = pnand %p448_p3, %p447_p2  ;;  %p453_p8 = scmp.lt.u32.totalorder %s451_s17, %s446_s9 }
  0x1a   : > { %p455_p9 = scmp.lt.u32.totalorder %s446_s9, %s662_s4 }
  0x1b   : > { %p450_p7 = pneg %p449_p4  ;;  %p454_p10 = por %p453_p8, %p452_p5 }
  0x1d   : > { %p456_p0 = por %p455_p9, %p454_p10 }
  0x1f   : > { %p457_p1 = pnand %p456_p0, %p450_p7 }
  0x21   : > { %460 = shalt.err (!%p457_p1)
}
  0x22   : > { %s461_s22 = scalar_lea.vmem %s670_s6, 32  ;;  %s576_s26 = smov [#allocation2]  }
  0x23   : > { %p462_p2 = scmp.ne.s32.totalorder %s670_s6, %s461_s22  ;;  %s466_s27 = sshll.u32 %s576_s26, 4  ;;  %s467_s27 = int_to_ptr.vmem [resolvable:$false] %s466_s27 }
  0x24   : > { %s468_s28 = scalar_lea.vmem %s467_s27, 64  ;;  %p469_p11 = scmp.lt.s32.totalorder %s670_s6, %s467_s27 }
  0x25   : > { %p464_p4 = pnand %p462_p2, %p448_p3  ;;  %p470_p5 = scmp.lt.s32.totalorder %s468_s28, %s461_s22 }
  0x27   : > { %p465_p12 = pneg %p464_p4  ;;  %p471_p8 = por %p470_p5, %p469_p11 }
  0x29   : > { %p472_p9 = pnand %p471_p8, %p465_p12 }
  0x2b   : > { %475 = shalt.err (!%p472_p9)
}
  0x2c   : > { %404 = dma.hbm_to_vmem [thread:$0]  (!%p666_p13), %s662_s4, 32, %s670_s6, %s146_s8  }
  0x2d   : > { %p826_p0 = scmp.lt.s32.totalorder %s574_s15, 3  ;;  %p827_p1 = scmp.ge.s32.totalorder %s574_s15, 1 }
  0x2f   : > { %p168_p3 = pnand %p827_p1, %p826_p0 }
  0x30   : > { %s704_s29 = sand.u32 (!%p168_p3), 1, %s566_s13  }
  0x31   : > { %171 = sbr.rel (%p168_p3) target bundleno = 111 (0x6f), region = 28  ;;  %s382_s30 = sshll.u32 (!%p168_p3), %s704_s29, 1 }
  0x32   : > { %s174_s5 = scalar_lea.sflag (!%p168_p3), [#allocation3], %s704_s29  ;;  %s177_s9 = scalar_lea.vmem (!%p168_p3), [#allocation2], %s382_s30 }
  0x38   : > { %549 = dma.done.wait (%p642_p6), %s174_s5, 32  }
  0x39   : > { %551 = vsyncadd (%p642_p6), %s174_s5, 4294967264  ;;  %p207_p11 = scmp.lt.s32.totalorder %s620_s16, 1  ;;  %s383_s6 = sshll.u32 %s704_s29, 2  ;;  %v210_v0 = vld [vmem:[%s177_s9] sm:$0x1] }
  0x3a   : > { %v211_v1 = vld [vmem:[%s177_s9 + $0x1] sm:$0x1]  ;;  %vm213_vm0 = vcmp.gt.f32.partialorder %v210_v0, -9.9999  ;;  %vm214_vm1 = vcmp.lt.f32.partialorder %v210_v0, 9.9999 }
  0x3b   : > { %s208_s4 = scalar_select %p207_p11, %s620_s16, 1  ;;  %vm216_vm2 = vcmp.gt.f32.partialorder %v211_v1, -9.9999  ;;  %vm215_vm3 = vmand %vm213_vm0, %vm214_vm1  ;;  %vm218_vm4 = vcmp.lt.f32.partialorder %v211_v1, 9.9999  ;;  %v384_v3 = vadd.f32 10.0, %v210_v0 }
  0x3c   : > { %v385_v4 = vadd.f32 10.0, %v211_v1  ;;  %vm217_vm5 = vmand %vm215_vm3, %vm216_vm2  ;;  %s200_s23 = scalar_lea.vmem [#allocation5], %s383_s6  ;;  %s387_s17 = sshll.u32 %s620_s16, 6 }
  0x3d   : > { %s209_s10 = scalar_lea.vmem %s817_s1, %s208_s4  ;;  %vm718_vm6 = vmand %vm217_vm5, %vm218_vm4  ;;  %v221_v6 = vmul.f32 0.8, %v384_v3  ;;  %s256_s11 = sshll.u32 %s200_s23, 4  ;;  %s729_s11 = int_to_ptr.vmem [resolvable:$true] %s256_s11 }
  0x3e   : > { %v212_v2 = vld [vmem:[%s209_s10] sm:$0x1]  ;;  %v225_v7 = vmul.f32 0.8, %v385_v4  ;;  %s734_s22 = scalar_lea.hbm %s818_s2, %s387_s17  ;;  %s206_s26 = scalar_lea.vmem [#allocation6], %s704_s29 }
  0x3f   : > { %v228_v8 = vsel %vm718_vm6, %v212_v2, 0  ;;  %v222_v9 = vsel %vm718_vm6, %v221_v6, 0.0  ;;  %s739_s27 = sshll.u32 %s206_s26, 4  ;;  %s239_s28 = scalar_lea.sflag [#allocation4], %s704_s29  ;;  %s765_s27 = int_to_ptr.vmem [resolvable:$true] %s739_s27 }
  0x40   : > { %234 = vst [vmem:[%s200_s23] sm:$0x1] %v228_v8  ;;  %v226_v10 = vsel %vm718_vm6, %v225_v7, 0.0  ;;  %v391_v11 = vtrunc.f32 %v222_v9  ;;  %v229_v13 = vmul.u32 256, %v228_v8  ;;  %s476_s30 = scalar_lea.vmem %s729_s11, 64  ;;  %p830_p12 = scmp.ne.s32.totalorder %s823_s24, 0 }
  0x41   : > { %v393_v12 = vtrunc.f32 %v226_v10  ;;  %p477_p6 = scmp.ne.s32.totalorder %s729_s11, %s476_s30  ;;  %s577_s5 = smov [#allocation5]  }
  0x42   : > { %v392_v14 = vcvt.f32.s32 %v391_v11  ;;  %s480_s9 = sshll.u32 %s577_s5, 4  ;;  %s481_s9 = int_to_ptr.vmem [resolvable:$false] %s480_s9 }
  0x43   : > { %v394_v15 = vcvt.f32.s32 %v393_v12  ;;  %p478_p13 = pnand %p477_p6, %p830_p12  ;;  %s482_s4 = scalar_lea.vmem %s481_s9, 128 }
  0x44   : > { %v230_v16 = vmul.u32 16, %v392_v14  ;;  %235 = vst [vmem:[%s200_s23 + $0x1] sm:$0x1] %v392_v14  ;;  %p483_p10 = scmp.lt.s32.totalorder %s729_s11, %s481_s9  ;;  %p484_p2 = scmp.lt.s32.totalorder %s482_s4, %s476_s30 }
  0x45   : > { %236 = vst [vmem:[%s200_s23 + $0x2] sm:$0x1] %v394_v15  ;;  %p479_p7 = pneg %p478_p13 }
  0x46   : > { %p485_p4 = por %p484_p2, %p483_p10 }
  0x48   : > { %p486_p5 = pnand %p485_p4, %p479_p7 }
  0x4a   : > { %489 = shalt.err (!%p486_p5)
}
  0x4b   : > { %s490_s6 = scalar_lea.hbm %s734_s22, 64  ;;  %s494_s10 = scalar_lea.hbm %s818_s2, 128 }
  0x4c   : > { %p491_p8 = scmp.ne.s32.totalorder %s734_s22, %s490_s6  ;;  %p495_p1 = scmp.lt.u32.totalorder %s734_s22, %s818_s2 }
  0x4d   : > { %p496_p3 = scmp.lt.u32.totalorder %s494_s10, %s490_s6  ;;  %p498_p6 = scmp.lt.u32.totalorder %s490_s6, %s734_s22 }
  0x4e   : > { %p492_p9 = pnand %p491_p8, %p830_p12 }
  0x4f   : > { %p497_p11 = por %p496_p3, %p495_p1 }
  0x50   : > { %p493_p0 = pneg %p492_p9 }
  0x51   : > { %p499_p13 = por %p498_p6, %p497_p11 }
  0x53   : > { %p500_p7 = pnand %p499_p13, %p493_p0 }
  0x55   : > { %503 = shalt.err (!%p500_p7)
}
  0x56   : > { %397 = dma.vmem_to_hbm [thread:$0]  (%p830_p12), %s729_s11, 64, %s734_s22, %s239_s28   ;;  %v231_v17 = vadd.s32 %v230_v16, %v229_v13 }
  0x57   : > { %s388_s19 = sshll.u32 %s620_s16, 4  ;;  %s244_s9 = scalar_lea.sflag [#allocation7], %s704_s29 }
  0x58   : > { %v232_v18 = vadd.s32 %v394_v15, %v231_v17  ;;  %s770_s5 = scalar_lea.hbm %s819_s3, %s388_s19  ;;  %s504_s11 = scalar_lea.vmem %s765_s27, 16 }
  0x59   : > { %p505_p10 = scmp.ne.s32.totalorder %s765_s27, %s504_s11  ;;  %s578_s16 = smov [#allocation6]  }
  0x5a   : > { %v233_v19 = vsel %vm718_vm6, %v232_v18, 2147483647  ;;  %s508_s22 = sshll.u32 %s578_s16, 4  ;;  %s509_s22 = int_to_ptr.vmem [resolvable:$false] %s508_s22 }
  0x5b   : > { %237 = vst [vmem:[%s206_s26] sm:$0x1] %v233_v19  ;;  %p506_p2 = pnand %p505_p10, %p830_p12  ;;  %s510_s28 = scalar_lea.vmem %s509_s22, 32 }
  0x5c   : > { %p511_p5 = scmp.lt.s32.totalorder %s765_s27, %s509_s22  ;;  %p512_p8 = scmp.lt.s32.totalorder %s510_s28, %s504_s11 }
  0x5d   : > { %p507_p4 = pneg %p506_p2 }
  0x5e   : > { %p513_p9 = por %p512_p8, %p511_p5 }
  0x60   : > { %p514_p0 = pnand %p513_p9, %p507_p4 }
  0x62   : > { %517 = shalt.err (!%p514_p0)
}
  0x63   : > { %s518_s29 = scalar_lea.hbm %s770_s5, 16  ;;  %s522_s6 = scalar_lea.hbm %s819_s3, 32 }
  0x64   : > { %p519_p1 = scmp.ne.s32.totalorder %s770_s5, %s518_s29  ;;  %p523_p6 = scmp.lt.u32.totalorder %s770_s5, %s819_s3 }
  0x65   : > { %p524_p13 = scmp.lt.u32.totalorder %s522_s6, %s518_s29  ;;  %p526_p10 = scmp.lt.u32.totalorder %s518_s29, %s770_s5 }
  0x66   : > { %p520_p3 = pnand %p519_p1, %p830_p12 }
  0x67   : > { %p525_p7 = por %p524_p13, %p523_p6 }
  0x68   : > { %p521_p11 = pneg %p520_p3 }
  0x69   : > { %p527_p2 = por %p526_p10, %p525_p7 }
  0x6b   : > { %p528_p4 = pnand %p527_p2, %p521_p11 }
  0x6d   : > { %531 = shalt.err (!%p528_p4)
}
  0x6e   : > { %398 = dma.vmem_to_hbm [thread:$0]  (%p830_p12), %s765_s27, 16, %s770_s5, %s244_s9  }
  0x6f PF: > { %s281_s10 = sand.u32 1, %s562_s12   ;;  %p831_p5 = scmp.ne.s32.totalorder %s824_s25, 0 }
  0x70   : > { %p832_p8 = scmp.ge.s32.totalorder %s574_s15, 2  ;;  %s282_s23 = scalar_lea.sflag [#allocation4], %s281_s10 }
  0x72   : > { %p406_p9 = pnand %p832_p8, %p831_p5 }
  0x74   : > { %553 = dma.done.wait (!%p406_p9), %s282_s23, 64  }
  0x75   : > { %555 = vsyncadd (!%p406_p9), %s282_s23, 4294967232  ;;  %s291_s17 = scalar_lea.sflag [#allocation7], %s281_s10 }
  0x76   : > { %557 = dma.done.wait (!%p406_p9), %s291_s17, 16  }
  0x77   : > { %559 = vsyncadd (!%p406_p9), %s291_s17, 4294967280  ;;  %p20_p12 = scmp.ge.s32.totalorder %s624_s18, 4   ;;  %s833_s12 = smov %s566_s13 }
  0x78   : > { %s834_s13 = smov %s570_s14  ;;  %s835_s14 = smov %s636_s21 }
  0x79   : > { %s836_s15 = smov %s624_s18  ;;  %22 = sbr.rel (!%p20_p12) target bundleno = 7 (0x7), region = 93 }
  0x80   :  { %295 = vsyncpa [#allocation3], 1 }
  0x81   :  { %297 = vsyncpa [#allocation3 + $0x1], 1 }
  0x82   :  { %298 = vsyncpa [#allocation4], 1 }
  0x83   :  { %300 = vsyncpa [#allocation4 + $0x1], 1 }
  0x84   :  { %301 = vsyncpa [#allocation7], 1 }
  0x85   :  { %303 = vsyncpa [#allocation7 + $0x1], 1 }

</bundles_post_ra>
